<compile_context>
chip_gen: v7x
topology: tpu7x:2x2x1
jax: 0.10.0
libtpu: 0.0.40
codegen_flags: <defaults>
</compile_context>

<pallas_src>
import jax
import jax.numpy as jnp
from jax.experimental import pallas as pl
from jax.experimental.pallas import tpu as pltpu


def _round_up(v, m):
    return ((v + m - 1) // m) * m


def _axis_semantics(grid_size):
    """CORE_PARALLEL on multi-TC chips (v7x) when there is work to split,
    plain 'parallel' otherwise (measured equivalent to 'arbitrary' on 1-TC chips)."""
    try:
        kind = jax.devices()[0].device_kind.lower()
    except Exception:
        kind = ""
    if "v7" in kind and grid_size >= 2:
        return (pltpu.CORE_PARALLEL,)
    return ("parallel",)


def _vmem_limit(in_block_bytes, out_block_bytes, resident_bytes):
    """Scoped-VMEM limit derived from the double-buffered footprint (2x margin)."""
    need = 2 * (in_block_bytes + out_block_bytes) + resident_bytes
    return int(min(64 << 20, max(16 << 20, 2 * need)))


# --------------------------------------------------------------------------- #
# Kernels                                                                     #
# --------------------------------------------------------------------------- #
def _nlinear_lane_kernel(x_ref, w_ref, b_ref, o_ref):
    # x_ref: (L, TN)   batch folded into lanes
    # w_ref: (P_pad, L) folded weight W' (normalization baked in), resident
    # b_ref: (P_pad, 1) f32 bias column, resident
    # o_ref: (P_pad, TN) lane-dense output tile
    y = jnp.dot(w_ref[...], x_ref[...], preferred_element_type=jnp.float32)
    o_ref[...] = (y + b_ref[...]).astype(o_ref.dtype)


def _nlinear_native_kernel(x_ref, w_ref, b_ref, o_ref):
    # x_ref: (TB, L, C) native [B,L,C] layout (C on lanes, L on sublanes)
    # w_ref: (P, L)     folded weight W', resident
    # b_ref: (P, 1)     f32 bias column, resident
    # o_ref: (TB, P, C) output directly in [B,P,C] order
    x = x_ref[...]
    w = w_ref[...]
    if w.dtype != x.dtype:                       # keep mixed-precision callers safe
        ct = jnp.promote_types(w.dtype, x.dtype)
        x = x.astype(ct)
        w = w.astype(ct)
    wb = jnp.broadcast_to(w, (x.shape[0],) + w.shape)          # (TB, P, L), cheap
    y = jax.lax.dot_general(                                    # batched MXU matmul
        wb, x,
        dimension_numbers=(((2,), (1,)), ((0,), (0,))),         # batch TB, contract L
        preferred_element_type=jnp.float32)                     # (TB, P, C)
    o_ref[...] = (y + b_ref[...]).astype(o_ref.dtype)


# --------------------------------------------------------------------------- #
# Wrappers                                                                    #
# --------------------------------------------------------------------------- #
def _nlinear_last_channel(x, w_eff, bias_col, lane_tile, itemsize):
    """n_targs == 1: only channel C-1 survives the final select -> compute just it.
    Y[P_pad, B_pad] = W' @ X[L, B_pad] + bias, with batch folded into lanes."""
    B, L, C = x.shape
    P = w_eff.shape[0]
    x_dtype = x.dtype

    sub = 8 * max(1, 4 // itemsize)              # sublane pack: 8 f32, 16 bf16, 32 int8
    P_pad = _round_up(P, sub)

    x2 = x[:, :, C - 1].T                        # (L, B) — tiny slab, cheap re-layout
    N_pad = _round_up(B, 128)                    # pad lanes to 128 only (NOT to the tile)
    if N_pad != B:
        x2 = jnp.pad(x2, ((0, 0), (0, N_pad - B)))
    tn = min(_round_up(lane_tile, 128), N_pad)   # large lane tiles; single block if small
    grid = pl.cdiv(N_pad, tn)                    # trailing partial block masked by Pallas

    wp = jnp.pad(w_eff, ((0, P_pad - P), (0, 0))) if P_pad != P else w_eff
    bp = jnp.pad(bias_col, ((0, P_pad - P), (0, 0))) if P_pad != P else bias_col

    in_bytes = L * tn * itemsize
    out_bytes = P_pad * tn * itemsize
    resident = P_pad * L * jnp.dtype(wp.dtype).itemsize + P_pad * 4

    out = pl.pallas_call(
        _nlinear_lane_kernel,
        out_shape=jax.ShapeDtypeStruct((P_pad, N_pad), x_dtype),
        grid_spec=pltpu.PrefetchScalarGridSpec(
            num_scalar_prefetch=0,
            grid=(grid,),
            in_specs=[
                pl.BlockSpec((L, tn), lambda n: (0, n)),       # activations, lane-tiled
                pl.BlockSpec((P_pad, L), lambda n: (0, 0)),    # folded weight, resident
                pl.BlockSpec((P_pad, 1), lambda n: (0, 0)),    # f32 bias, resident
            ],
            out_specs=pl.BlockSpec((P_pad, tn), lambda n: (0, n)),
        ),
        compiler_params=pltpu.CompilerParams(
            dimension_semantics=_axis_semantics(grid),
            vmem_limit_bytes=_vmem_limit(in_bytes, out_bytes, resident),
        ),
    )(x2, wp, bp)
    return out[:P, :B].T                         # (B, P); padded rows/lanes discarded


def _nlinear_all_channels(x, w_eff, bias_col, batch_tile_bytes, itemsize):
    """n_targs != 1: native-layout kernel, zero wrapper transposes.
    Grid over batch tiles; each step DMAs a (TB,L,C) slab of x and writes a
    (TB,P,C) slab of y directly in [B,P,C] order."""
    B, L, C = x.shape
    P = w_eff.shape[0]
    x_dtype = x.dtype

    per_batch = (L + P) * C * itemsize           # in+out bytes per batch element
    tb = max(1, batch_tile_bytes // max(per_batch, 1))
    tb = int(min(tb, 512, B))                    # cap bounds batched-matmul size & VMEM
    grid = pl.cdiv(B, tb)                        # trailing partial batch tile masked

    in_bytes = tb * L * C * itemsize
    out_bytes = tb * P * C * itemsize
    resident = P * L * jnp.dtype(w_eff.dtype).itemsize + P * 4

    out = pl.pallas_call(
        _nlinear_native_kernel,
        out_shape=jax.ShapeDtypeStruct((B, P, C), x_dtype),
        grid_spec=pltpu.PrefetchScalarGridSpec(
            num_scalar_prefetch=0,
            grid=(grid,),
            in_specs=[
                pl.BlockSpec((tb, L, C), lambda b: (b, 0, 0)),  # x, native layout
                pl.BlockSpec((P, L), lambda b: (0, 0)),         # folded weight, resident
                pl.BlockSpec((P, 1), lambda b: (0, 0)),         # f32 bias, resident
            ],
            out_specs=pl.BlockSpec((tb, P, C), lambda b: (b, 0, 0)),
        ),
        compiler_params=pltpu.CompilerParams(
            dimension_semantics=_axis_semantics(grid),
            vmem_limit_bytes=_vmem_limit(in_bytes, out_bytes, resident),
        ),
    )(x, w_eff, bias_col)
    return out                                   # (B, P, C) — no un-transpose needed


def nlinear_forward(x, weight, bias, n_targs=1, lane_tile=16384,
                    batch_tile_bytes=2 << 20, cast_weight_to_x_dtype=False):
    """NLinear forward (individual=False path).

    x: [B, L, C], weight: [P, L], bias: [P].
    Returns [B, P] if n_targs == 1 else [B, P, C].
    """
    B, L, C = x.shape
    P = weight.shape[0]
    itemsize = jnp.dtype(x.dtype).itemsize

    # Fold the NLinear normalization (subtract last step, add it back) into W:
    #   y = W @ (x - last) + b + last  ==  W' @ x + b,
    #   W'[p,l] = W[p,l] + [l == L-1] * (1 - sum_k W[p,k]).
    w32 = weight.astype(jnp.float32)
    w_eff = w32.at[:, L - 1].add(1.0 - jnp.sum(w32, axis=1))
    w_eff = w_eff.astype(x.dtype if cast_weight_to_x_dtype else weight.dtype)
    bias_col = bias.astype(jnp.float32).reshape(P, 1)

    if n_targs == 1:
        return _nlinear_last_channel(x, w_eff, bias_col, lane_tile, itemsize)
    return _nlinear_all_channels(x, w_eff, bias_col, batch_tile_bytes, itemsize)


def nlinear_reference(x, weight, bias, n_targs=1):
    """Pure-JAX reference mirroring the PyTorch forward (individual=False path)."""
    seq_last = x[:, -1:, :]
    xn = x - seq_last
    y = jnp.einsum("blc,pl->bpc", xn, weight) + bias[None, :, None]
    y = y + seq_last
    if n_targs == 1:
        return y[:, :, -1]
    return y


if __name__ == "__main__":
    # Module config (small, consistent with NLinear: individual=False)
    forecast_history = 8     # seq_len (L)
    forecast_length = 4      # pred_len (P)
    enc_in = 32              # channels (C)
    batch = 2

    key = jax.random.PRNGKey(0)
    kx, kw, kb = jax.random.split(key, 3)

    x = jax.random.normal(kx, (batch, forecast_history, enc_in), dtype=jnp.float32)

    # PyTorch nn.Linear-style uniform init, bound 1/sqrt(in_features)
    bound = 1.0 / (forecast_history ** 0.5)
    weight = jax.random.uniform(kw, (forecast_length, forecast_history),
                                minval=-bound, maxval=bound, dtype=jnp.float32)
    bias = jax.random.uniform(kb, (forecast_length,),
                              minval=-bound, maxval=bound, dtype=jnp.float32)

    # --- n_targs == 1 (specialized last-channel, lane-folded matmul) ------------
    out1 = jax.block_until_ready(nlinear_forward(x, weight, bias, n_targs=1))
    ref1 = nlinear_reference(x, weight, bias, n_targs=1)
    assert out1.shape == (batch, forecast_length), out1.shape
    assert jnp.allclose(out1, ref1, atol=1e-5, rtol=1e-5), "mismatch vs reference (n_targs=1)"

    # --- n_targs != 1 (native [B,L,C] layout, output [B,P,C] directly) ----------
    out3 = jax.block_until_ready(nlinear_forward(x, weight, bias, n_targs=enc_in))
    ref3 = nlinear_reference(x, weight, bias, n_targs=enc_in)
    assert out3.shape == (batch, forecast_length, enc_in), out3.shape
    assert jnp.allclose(out3, ref3, atol=1e-5, rtol=1e-5), "mismatch vs reference (full)"

    # TODO(synk): individual=True path (per-channel nn.Linear ModuleList) not implemented;
    # it would use a (C, P, L) weight stack with a channel-tiled grid axis.
    print("KERNEL_OK")
</pallas_src>

<mosaic_0001>
module attributes {stable_mosaic.version = 11 : i64} {
  func.func @_nlinear_lane_kernel(%arg0: i32, %arg1: memref<8x128xf32, #tpu.memory_space<vmem>>, %arg2: memref<8x8xf32, #tpu.memory_space<vmem>>, %arg3: memref<8x1xf32, #tpu.memory_space<vmem>>, %arg4: memref<8x128xf32, #tpu.memory_space<vmem>>) attributes {dimension_semantics = [#tpu.dimension_semantics<parallel>], iteration_bounds = array<i64: 1>, scalar_prefetch = 0 : i64, scratch_operands = 0 : i64, tpu.core_type = #tpu.core_type<tc>, window_params = [{transform_indices = @transform_0, window_bounds = array<i64: 8, 128>}, {pipeline_mode = #tpu.pipeline_mode<synchronous>, transform_indices = @transform_1, window_bounds = array<i64: 8, 8>}, {pipeline_mode = #tpu.pipeline_mode<synchronous>, transform_indices = @transform_2, window_bounds = array<i64: 8, 1>}, {transform_indices = @transform_3, window_bounds = array<i64: 8, 128>}]} {
    %c0 = arith.constant 0 : index
    %c0_0 = arith.constant 0 : index
    %0 = vector.load %arg2[%c0, %c0_0] : memref<8x8xf32, #tpu.memory_space<vmem>>, vector<8x8xf32>
    %c0_1 = arith.constant 0 : index
    %c0_2 = arith.constant 0 : index
    %1 = vector.load %arg1[%c0_1, %c0_2] : memref<8x128xf32, #tpu.memory_space<vmem>>, vector<8x128xf32>
    %cst = arith.constant dense<0.000000e+00> : vector<8x128xf32>
    %2 = tpu.matmul %0, %1, %cst {dimension_numbers = #tpu.dot_dimension_numbers<[1], [0], [0], [1], [0, 0, 1, 1], [], []>} : vector<8x8xf32>, vector<8x128xf32>, vector<8x128xf32> -> vector<8x128xf32>
    %c0_3 = arith.constant 0 : index
    %c0_4 = arith.constant 0 : index
    %3 = vector.load %arg3[%c0_3, %c0_4] : memref<8x1xf32, #tpu.memory_space<vmem>>, vector<8x1xf32>
    %4 = vector.broadcast %3 : vector<8x1xf32> to vector<8x128xf32>
    %5 = arith.addf %2, %4 : vector<8x128xf32>
    %c0_5 = arith.constant 0 : index
    %c0_6 = arith.constant 0 : index
    %6 = vector.load %arg4[%c0_5, %c0_6] : memref<8x128xf32, #tpu.memory_space<vmem>>, vector<8x128xf32>
    tpu.vector_store %arg4[%c0_5, %c0_6], %5 {strides = array<i32>} : memref<8x128xf32, #tpu.memory_space<vmem>>, vector<8x128xf32>,
    return
  }
  func.func @transform_0(%arg0: i32) -> (i32, i32) {
    %c0_i32 = arith.constant 0 : i32
    %c0_i32_0 = arith.constant 0 : i32
    return %c0_i32, %arg0 : i32, i32
  }
  func.func @transform_1(%arg0: i32) -> (i32, i32) {
    %c0_i32 = arith.constant 0 : i32
    %c0_i32_0 = arith.constant 0 : i32
    %c0_i32_1 = arith.constant 0 : i32
    return %c0_i32, %c0_i32_0 : i32, i32
  }
  func.func @transform_2(%arg0: i32) -> (i32, i32) {
    %c0_i32 = arith.constant 0 : i32
    %c0_i32_0 = arith.constant 0 : i32
    %c0_i32_1 = arith.constant 0 : i32
    return %c0_i32, %c0_i32_0 : i32, i32
  }
  func.func @transform_3(%arg0: i32) -> (i32, i32) {
    %c0_i32 = arith.constant 0 : i32
    %c0_i32_0 = arith.constant 0 : i32
    return %c0_i32, %arg0 : i32, i32
  }
}

</mosaic_0001>

<bundles_post_ra>
// kernel: tpu_custom_call.1
= control target key start
LH: loop header
LB: loop body
LE: loop exit
PB: predicated region body
PF: predicated region fallthrough
CT: control target
= control target key end

     0   :  { %8 = vsyncpa [#allocation3], 0  ;;  %s242_s0 = inlined_call_operand.vmem [shape: f32[8,128], index: 0, kind: input, shape index: {}]   ;;  %s243_s1 = inlined_call_operand.hbm [shape: f32[8,8], index: 1, kind: input, shape index: {}]   ;;  %s244_s2 = inlined_call_operand.vmem [shape: f32[8,1], index: 2, kind: input, shape index: {}]   ;;  %s245_s3 = inlined_call_operand.hbm [shape: f32[8,128], index: 3, kind: output, shape index: {}]  }
   0x1   :  { %9 = vsyncpa [#allocation4], 0  ;;  %s187_s12 = smov [#allocation2]   ;;  %s139_s16 = scalar_lea.hbm %s243_s1, 128 }
   0x2   :  { %s18_s13 = sshll.u32 %s187_s12, 4  ;;  %p140_p0 = scmp.ne.s32.totalorder %s243_s1, %s139_s16  ;;  %s19_s13 = int_to_ptr.vmem [resolvable:$true] %s18_s13 }
   0x3   :  { %p143_p1 = scmp.lt.u32.totalorder %s139_s16, %s243_s1 }
   0x5   :  { %p145_p2 = pnand %p143_p1, %p140_p0 }
   0x7   :  { %148 = shalt.err (!%p145_p2)
}
   0x8   :  { %s149_s21 = scalar_lea.vmem %s19_s13, 128  ;;  %p154_p4 = scmp.lt.s32.totalorder %s19_s13, %s19_s13 }
   0x9   :  { %p150_p3 = scmp.ne.s32.totalorder %s19_s13, %s149_s21  ;;  %p155_p5 = scmp.lt.s32.totalorder %s149_s21, %s149_s21 }
   0xb   :  { %p156_p6 = por %p155_p5, %p154_p4 }
   0xd   :  { %p157_p7 = pnand %p156_p6, %p150_p3 }
   0xf   :  { %160 = shalt.err (!%p157_p7)
}
  0x10   :  { %21 = dma.hbm_to_vmem [thread:$0]  %s243_s1, 128, %s19_s13, [#allocation3]  }
  0x11   :  { %183 = dma.done.wait [#allocation3], 128  }
  0x12   :  { %184 = vsyncadd [#allocation3], 4294967168  ;;  %v188_v0 = vmov 0.0   ;;  %vm189_vm0 = vmmov 0   ;;  %v190_v1 = vmov 0   ;;  %vm35_vm1 = vcmask 64512  }
  0x13   :  { %128 = vmatprep.subr.mxu0 %v188_v0  ;;  %130 = vmatprep.mubr.msk.f32.mxu0 %vm189_vm0, %v188_v0  ;;  %v28_v2 = vld [vmem:[%s242_s0] sm:$0xff]  ;;  %s191_s1 = smov [#allocation5]  }
  0x14   :  { %138 = vset.pattern.permute.xlu0 %v190_v1  ;;  %v27_v3 = vld [vmem:[#allocation2] sm:$0xff]  ;;  %129 = vmatpush3.msra.mxu0 %v28_v2  ;;  %s116_s28 = sshll.u32 %s191_s1, 4  ;;  %s117_s28 = int_to_ptr.vmem [resolvable:$true] %s116_s28 }
  0x15   :  { %v29_v4 = vld [vmem:[%s244_s2] sm:$0xff]  ;;  %131 = vmatmul.mubr.msk.f32.vlgmr.msra.gmra.mrb[0].mxu0 %vm35_vm1, %v27_v3  ;;  %s161_s29 = scalar_lea.vmem %s117_s28, 128  ;;  %p166_p9 = scmp.lt.s32.totalorder %s117_s28, %s117_s28 }
  0x16   :  { %32 = vperm.xlu0 %138, %v29_v4   ;;  %p162_p8 = scmp.ne.s32.totalorder %s117_s28, %s161_s29  ;;  %p167_p10 = scmp.lt.s32.totalorder %s161_s29, %s161_s29 }
  0x18   :  { %p168_p11 = por %p167_p10, %p166_p9 }
  0x1a   :  { %p169_p12 = pnand %p168_p11, %p162_p8 }
  0x95   :  { %v33_v5 = vpop.permute.xlu0 %32 }
  0xe8   :  { %v105_v6 = vpop.f32.mrb[0].mxu0 }
  0xe9   :  { %v106_v7 = vadd.f32 %v105_v6, %v33_v5  ;;  %v132_v8 = vpop.f32.mrb[1].mxu0 }
  0xeb   :  { %109 = vst [vmem:[#allocation5] sm:$0xff] %v106_v7 }
  0xec   :  { %172 = shalt.err (!%p169_p12)
}
  0xed   :  { %s173_s30 = scalar_lea.hbm %s245_s3, 128 }
  0xee   :  { %p174_p13 = scmp.ne.s32.totalorder %s245_s3, %s173_s30  ;;  %p177_p0 = scmp.lt.u32.totalorder %s173_s30, %s245_s3 }
  0xf0   :  { %p179_p1 = pnand %p177_p0, %p174_p13 }
  0xf2   :  { %182 = shalt.err (!%p179_p1)
}
  0xf3   :  { %119 = dma.vmem_to_hbm [thread:$0]  %s117_s28, 128, %s245_s3, [#allocation4]  }
  0xf4   :  { %185 = dma.done.wait [#allocation4], 128  }
  0xf5   :  { %186 = vsyncadd [#allocation4], 4294967168 }
  0xf6   :  { %123 = vsyncpa [#allocation3], 1 }
  0xf7   :  { %124 = vsyncpa [#allocation4], 1 }

</bundles_post_ra>
